<compile_context>
chip_gen: v6e
topology: v6e:2x2x1
jax: 0.10.0
libtpu: 0.0.40
codegen_flags: <defaults>
</compile_context>

<pallas_src>
import random
import numpy as np

import jax
import jax.numpy as jnp
from jax import lax
from jax.experimental import pallas as pl
from jax.experimental.pallas import tpu as pltpu


# ----------------------------------------------------------------------------
# In-kernel helpers
# ----------------------------------------------------------------------------
def _cross_neighbor_sum(m, D, H, W):
    """voxel + its 6 face neighbours (zero padded) on a (D, H*W) float32 tile.

    Pure data movement: pltpu.roll along the sublane axis for the D neighbours
    and along the lane axis (shift W and 1) for the H / W neighbours, with iota
    masks re-creating the zero padding at the volume boundary.  Only positive
    roll amounts are used (roll(-k) == roll(size-k)).
    """
    HW = H * W
    d_idx = lax.broadcasted_iota(jnp.int32, m.shape, 0)
    col = lax.broadcasted_iota(jnp.int32, m.shape, 1)
    if W & (W - 1) == 0:
        w_idx = jnp.bitwise_and(col, W - 1)
    else:
        w_idx = lax.rem(col, W)
    zero = jnp.zeros_like(m)

    acc = m
    # D-axis face neighbours (sublane rolls).
    acc = acc + jnp.where(d_idx > 0, pltpu.roll(m, 1, axis=0), zero)
    acc = acc + jnp.where(d_idx < D - 1, pltpu.roll(m, D - 1, axis=0), zero)
    # H-axis face neighbours (lane rolls by +-W).
    acc = acc + jnp.where(col >= W, pltpu.roll(m, W, axis=1), zero)
    acc = acc + jnp.where(col < HW - W, pltpu.roll(m, HW - W, axis=1), zero)
    # W-axis face neighbours (lane rolls by +-1, masked at W-block boundaries).
    acc = acc + jnp.where(w_idx > 0, pltpu.roll(m, 1, axis=1), zero)
    acc = acc + jnp.where(w_idx < W - 1, pltpu.roll(m, HW - 1, axis=1), zero)
    return acc


def _sum_1x1(a):
    """Full reduction to a (1, 1) tile (lane reduce, then sublane reduce)."""
    return jnp.sum(jnp.sum(a, axis=1, keepdims=True), axis=0, keepdims=True)


# ----------------------------------------------------------------------------
# Fused "shift label boundary" step kernel
#   (mask extraction + dilation + mask2 multiply + dropout + volume cap +
#    x / trg relabel updates + sum(trg) output)
# ----------------------------------------------------------------------------
def _make_step_kernel(D, H, W, is_shrink):
    def kernel(x_ref, trg_ref, u1_ref, u2_ref, params_ref,
               x_out_ref, trg_out_ref, sum_out_ref):
        nbr_label = params_ref[0]
        write_label = params_ref[1]
        dropout_rate = params_ref[2]
        max_vol_change = params_ref[3]            # abs(change_remaining)

        x = x_ref[...]
        trg = trg_ref[...]
        nbr = (x == nbr_label).astype(jnp.float32)

        if is_shrink:     # dilate the neighbour into the (shrinking) target
            m1, m2 = nbr, trg
        else:             # dilate the (growing) target into the neighbour
            m1, m2 = trg, nbr

        # dil = DilateBinaryMask(m1) * m2   (cross conv > 0, zero padded)
        conv = _cross_neighbor_sum(m1, D, H, W)
        dil = jnp.where(conv > 0.5, m2, 0.0)

        # dropout 1 (identity when dropout_rate == 0: uniform >= 0 always holds)
        dil = jnp.where(u1_ref[...] >= dropout_rate, dil, 0.0)

        # cap at the remaining volume change.  Reference's conditional second
        # dropout: dr2 = max(0, (vc - |mvc|) / vc) is 0 (a no-op) when vc <= |mvc|.
        s_dil = _sum_1x1(dil)
        s_m2 = _sum_1x1(m2)
        vc = s_dil / s_m2
        dr2 = jnp.maximum(0.0, (vc - max_vol_change) / vc)
        dil = jnp.where(u2_ref[...] >= dr2, dil, 0.0)

        # label transfer:  x <- write_label where (m1 + dil) > 0 ;  trg -/+= dil
        grown = m1 + dil
        x_out_ref[...] = jnp.where(grown > 0.5, write_label, x)
        trg_new = trg - dil if is_shrink else trg + dil
        trg_out_ref[...] = trg_new
        sum_out_ref[...] = _sum_1x1(trg_new)

    return kernel


def _build_step_call(D, H, W, is_shrink):
    HW = H * W
    nvox = D * HW
    vol_spec = pl.BlockSpec((D, HW), lambda i: (0, 0))
    smem_spec = pl.BlockSpec(memory_space=pltpu.MemorySpace.SMEM)
    return pl.pallas_call(
        _make_step_kernel(D, H, W, is_shrink),
        grid=(1,),
        in_specs=[vol_spec, vol_spec, vol_spec, vol_spec, smem_spec],
        out_specs=(vol_spec, vol_spec, pl.BlockSpec((1, 1), lambda i: (0, 0))),
        out_shape=(
            jax.ShapeDtypeStruct((D, HW), jnp.float32),   # updated x
            jax.ShapeDtypeStruct((D, HW), jnp.float32),   # updated trg_mask
            jax.ShapeDtypeStruct((1, 1), jnp.float32),    # sum(trg_mask)
        ),
        input_output_aliases={0: 0, 1: 1},                # x, trg updated in place
        compiler_params=pltpu.CompilerParams(
            dimension_semantics=("arbitrary",)),
        cost_estimate=pl.CostEstimate(
            flops=64 * nvox, transcendentals=0, bytes_accessed=6 * nvox * 4),
    )


# ----------------------------------------------------------------------------
# Fused adjacency kernel: sum(dilate(x==l1) * dilate(x==l2)) in one pass
# ----------------------------------------------------------------------------
def _make_adj_kernel(D, H, W):
    def kernel(x_ref, labels_ref, out_ref):
        x = x_ref[...]
        m1 = (x == labels_ref[0]).astype(jnp.float32)
        m2 = (x == labels_ref[1]).astype(jnp.float32)
        d1 = jnp.where(_cross_neighbor_sum(m1, D, H, W) > 0.5, 1.0, 0.0)
        d2 = jnp.where(_cross_neighbor_sum(m2, D, H, W) > 0.5, 1.0, 0.0)
        out_ref[...] = _sum_1x1(d1 * d2)
    return kernel


def _build_adj_call(D, H, W):
    HW = H * W
    nvox = D * HW
    vol_spec = pl.BlockSpec((D, HW), lambda i: (0, 0))
    smem_spec = pl.BlockSpec(memory_space=pltpu.MemorySpace.SMEM)
    return pl.pallas_call(
        _make_adj_kernel(D, H, W),
        grid=(1,),
        in_specs=[vol_spec, smem_spec],
        out_specs=pl.BlockSpec((1, 1), lambda i: (0, 0)),
        out_shape=jax.ShapeDtypeStruct((1, 1), jnp.float32),
        compiler_params=pltpu.CompilerParams(
            dimension_semantics=("arbitrary",)),
        cost_estimate=pl.CostEstimate(
            flops=48 * nvox, transcendentals=0, bytes_accessed=4 * nvox),
    )


# ----------------------------------------------------------------------------
# Module
# ----------------------------------------------------------------------------
class ResizeLabelsPallas:
    """JAX/Pallas re-implementation of _ResizeLabels.forward()."""

    def __init__(self, slist, input_shape, max_perc_atrophy=0.5, subsample=1.0,
                 apply_dropout=False, dropout_rate=0.2, seed=0, max_iters=64):
        self.structure_list = slist
        self.subsample = subsample
        self.n_channels = input_shape[1]
        self.dropout_rate = float(dropout_rate) if apply_dropout else 0.0
        self.D = int(input_shape[2])
        self.H = int(input_shape[3])
        self.W = int(input_shape[4])
        self.HW = self.H * self.W
        self.max_iters = int(max_iters)       # termination guard (see TODO)
        self._seed = int(seed)
        self._n_forward = 0

        # one fused step kernel per direction (shrink / grow the target label)
        self._step_calls = {
            True: _build_step_call(self.D, self.H, self.W, True),
            False: _build_step_call(self.D, self.H, self.W, False),
        }
        self._adj_call = _build_adj_call(self.D, self.H, self.W)
        self._label_loops = {}     # (n_neighbors, is_shrink) -> jitted device loop
        self._adj_batches = {}     # n_pairs -> jitted batched adjacency

    # ---------------- device-side building blocks ----------------
    def _get_adj_batch(self, n_pairs):
        fn = self._adj_batches.get(n_pairs)
        if fn is not None:
            return fn
        adj_call = self._adj_call

        def run(x, pairs):                     # pairs: (n_pairs, 2) float32
            outs = [adj_call(x, pairs[i]) for i in range(n_pairs)]
            return jnp.concatenate(outs, axis=0)[:, 0]

        fn = jax.jit(run)
        self._adj_batches[n_pairs] = fn
        return fn

    def _get_label_loop(self, n_nbr, is_shrink):
        cache_key = (n_nbr, is_shrink)
        fn = self._label_loops.get(cache_key)
        if fn is not None:
            return fn
        step_call = self._step_calls[is_shrink]
        dropout_rate = self.dropout_rate
        max_iters = self.max_iters
        D, HW = self.D, self.HW

        def run(x, label_val, nbr_labels, target_vol_change, seed0):
            trg0 = (x == label_val).astype(jnp.float32)
            s_orig = jnp.sum(trg0)
            abs_target = jnp.abs(target_vol_change)
            key0 = jax.random.PRNGKey(seed0)

            def cond(carry):
                _x, _trg, vol_change, it = carry
                return jnp.logical_and(jnp.abs(vol_change) < abs_target,
                                       it < max_iters)

            def body(carry):
                x_c, trg_c, vol_change, it = carry
                change_remaining = target_vol_change - vol_change
                mvc_abs = jnp.abs(change_remaining)
                trg_sum = s_orig
                for j in range(n_nbr):                       # static unroll
                    nbr = nbr_labels[j]
                    write_label = nbr if is_shrink else label_val
                    params = jnp.stack(
                        [nbr, write_label, jnp.float32(dropout_rate),
                         mvc_abs]).astype(jnp.float32)
                    # dropout uniforms generated with jax.random (backend
                    # agnostic) and streamed into the fused step kernel
                    key = jax.random.fold_in(key0, it * n_nbr + j)
                    u = jax.random.uniform(key, (2, D, HW), dtype=jnp.float32)
                    x_c, trg_c, tsum = step_call(x_c, trg_c, u[0], u[1], params)
                    trg_sum = tsum[0, 0]
                vol_change_new = (trg_sum - s_orig) / s_orig
                return (x_c, trg_c, vol_change_new, it + 1)

            x_out, _, _, _ = lax.while_loop(
                cond, body, (x, trg0, jnp.float32(0.0), jnp.int32(0)))
            return x_out

        fn = jax.jit(run)
        self._label_loops[cache_key] = fn
        return fn

    # ---------------- reference control flow (host-side glue) ----------------
    def _resize_labels(self, x, slist):
        D, H, W, HW = self.D, self.H, self.W, self.HW
        # lane-dense (D, H*W) float32 working layout; N = C = 1 squeezed out.
        xv = jnp.asarray(x, jnp.float32).reshape(D, HW)

        for label_idx, label in enumerate(slist):
            nbr_list = list(slist[label][1:])

            # adjacency pre-pass: all pairs for this label in one device fetch
            if nbr_list:
                pairs = np.asarray([[label, nbr] for nbr in nbr_list],
                                   dtype=np.float32)
                adj = np.asarray(jax.device_get(
                    self._get_adj_batch(len(nbr_list))(xv, jnp.asarray(pairs))))
                adj_map = {nbr: bool(adj[i] > 0.0)
                           for i, nbr in enumerate(nbr_list)}
                # replicate the reference's pop-while-enumerating filter exactly
                i = 0
                while i < len(nbr_list):
                    if not adj_map[nbr_list[i]]:
                        nbr_list.pop(i)
                    i += 1

            target_vol_change = float(slist[label][0])
            if not nbr_list:
                # reference would loop forever with no adjacent neighbours; skip.
                continue

            is_shrink = target_vol_change < 0.0
            run = self._get_label_loop(len(nbr_list), is_shrink)
            seed_val = (self._seed +
                        1000003 * (self._n_forward * 131 + label_idx)) % 2147483647
            xv = run(xv,
                     jnp.float32(label),
                     jnp.asarray(np.asarray(nbr_list, dtype=np.float32)),
                     jnp.float32(target_vol_change),
                     jnp.int32(seed_val))

        return xv.reshape(1, 1, D, H, W)

    def _randomize_atrophy(self):
        # mirrors the reference host-side RNG structure (torch RNG not reproducible)
        n_atrophy = random.randint(2, len(self.structure_list))
        idxs_all = np.arange(len(self.structure_list))
        _ = np.random.choice(idxs_all, size=min(n_atrophy, len(idxs_all)),
                             replace=False)    # unused downstream, as in reference
        slist = {}
        for label in self.structure_list.keys():
            max_perc = self.structure_list[label][0]
            perc = (random.uniform(max_perc, 0.0) if max_perc < 0
                    else random.uniform(0.0, max_perc))
            slist[label] = [perc] + list(self.structure_list[label][1:])
        return slist

    def __call__(self, x):
        slist = self._randomize_atrophy()
        out = self._resize_labels(x, slist)
        self._n_forward += 1
        return out


if __name__ == "__main__":
    random.seed(0)
    np.random.seed(0)

    D = H = W = 16
    input_shape = (1, 1, D, H, W)

    # deterministic synthetic label volume: label 1 | 2 | 3 slabs along W
    _ = jax.random.PRNGKey(0)   # labels must be discrete; slabs are deterministic
    w_idx = jnp.arange(W)
    row = jnp.where(w_idx < 5, 1.0, jnp.where(w_idx < 11, 2.0, 3.0))
    x = jnp.broadcast_to(row, (1, 1, D, H, W)).astype(jnp.float32)

    # structure_list: {label: [max_perc_change, neighbor, ...]}
    structure_list = {1.0: [0.25, 2.0], 3.0: [-0.25, 2.0]}

    module = ResizeLabelsPallas(
        slist=structure_list,
        input_shape=input_shape,
        apply_dropout=True,
        dropout_rate=0.1,
        seed=0,
    )

    y = module(x)
    y = jax.block_until_ready(y)
    assert y.shape == x.shape and y.dtype == jnp.float32
    print("KERNEL_OK")
</pallas_src>

<mosaic_0001>
module attributes {stable_mosaic.version = 11 : i64} {
  func.func @kernel(%arg0: i32, %arg1: memref<16x256xf32, #tpu.memory_space<vmem>>, %arg2: memref<2xf32, #tpu.memory_space<smem>>, %arg3: memref<1x1xf32, #tpu.memory_space<vmem>>) attributes {dimension_semantics = [#tpu.dimension_semantics<arbitrary>], iteration_bounds = array<i64: 1>, scalar_prefetch = 0 : i64, scratch_operands = 0 : i64, tpu.core_type = #tpu.core_type<tc>, window_params = [{pipeline_mode = #tpu.pipeline_mode<synchronous>, transform_indices = @transform_0, window_bounds = array<i64: 16, 256>}, {transform_indices = @transform_1, window_bounds = array<i64: 2>}, {pipeline_mode = #tpu.pipeline_mode<synchronous>, transform_indices = @transform_2, window_bounds = array<i64: 1, 1>}]} {
    %c0 = arith.constant 0 : index
    %c0_0 = arith.constant 0 : index
    %0 = vector.load %arg1[%c0, %c0_0] : memref<16x256xf32, #tpu.memory_space<vmem>>, vector<16x256xf32>
    %c0_1 = arith.constant 0 : index
    %1 = memref.load %arg2[%c0_1] : memref<2xf32, #tpu.memory_space<smem>>
    %2 = vector.broadcast %1 : f32 to vector<16x256xf32>
    %3 = arith.cmpf oeq, %0, %2 : vector<16x256xf32>
    %4 = arith.extui %3 : vector<16x256xi1> to vector<16x256xi32>
    %5 = arith.sitofp %4 : vector<16x256xi32> to vector<16x256xf32>
    %c1 = arith.constant 1 : index
    %6 = memref.load %arg2[%c1] : memref<2xf32, #tpu.memory_space<smem>>
    %7 = vector.broadcast %6 : f32 to vector<16x256xf32>
    %8 = arith.cmpf oeq, %0, %7 : vector<16x256xf32>
    %9 = arith.extui %8 : vector<16x256xi1> to vector<16x256xi32>
    %10 = arith.sitofp %9 : vector<16x256xi32> to vector<16x256xf32>
    %11 = tpu.iota {dimensions = array<i32: 0>} : vector<16x256xi32>
    %12 = tpu.iota {dimensions = array<i32: 1>} : vector<16x256xi32>
    %c15_i32 = arith.constant 15 : i32
    %13 = vector.broadcast %c15_i32 : i32 to vector<16x256xi32>
    %14 = arith.andi %12, %13 : vector<16x256xi32>
    %cst = arith.constant 0.000000e+00 : f32
    %15 = vector.broadcast %cst : f32 to vector<16x256xf32>
    %c0_i32 = arith.constant 0 : i32
    %16 = vector.broadcast %c0_i32 : i32 to vector<16x256xi32>
    %17 = arith.cmpi sgt, %11, %16 : vector<16x256xi32>
    %c1_i32 = arith.constant 1 : i32
    %18 = tpu.dynamic_rotate %5 by %c1_i32 dim 0 : vector<16x256xf32>, i32 -> vector<16x256xf32>
    %19 = arith.select %17, %18, %15 : vector<16x256xi1>, vector<16x256xf32>
    %20 = arith.addf %5, %19 : vector<16x256xf32>
    %c15_i32_2 = arith.constant 15 : i32
    %21 = vector.broadcast %c15_i32_2 : i32 to vector<16x256xi32>
    %22 = arith.cmpi slt, %11, %21 : vector<16x256xi32>
    %c15_i32_3 = arith.constant 15 : i32
    %23 = tpu.dynamic_rotate %5 by %c15_i32_3 dim 0 : vector<16x256xf32>, i32 -> vector<16x256xf32>
    %24 = arith.select %22, %23, %15 : vector<16x256xi1>, vector<16x256xf32>
    %25 = arith.addf %20, %24 : vector<16x256xf32>
    %c16_i32 = arith.constant 16 : i32
    %26 = vector.broadcast %c16_i32 : i32 to vector<16x256xi32>
    %27 = arith.cmpi sge, %12, %26 : vector<16x256xi32>
    %c16_i32_4 = arith.constant 16 : i32
    %28 = tpu.dynamic_rotate %5 by %c16_i32_4 dim 1 : vector<16x256xf32>, i32 -> vector<16x256xf32>
    %29 = arith.select %27, %28, %15 : vector<16x256xi1>, vector<16x256xf32>
    %30 = arith.addf %25, %29 : vector<16x256xf32>
    %c240_i32 = arith.constant 240 : i32
    %31 = vector.broadcast %c240_i32 : i32 to vector<16x256xi32>
    %32 = arith.cmpi slt, %12, %31 : vector<16x256xi32>
    %c240_i32_5 = arith.constant 240 : i32
    %33 = tpu.dynamic_rotate %5 by %c240_i32_5 dim 1 : vector<16x256xf32>, i32 -> vector<16x256xf32>
    %34 = arith.select %32, %33, %15 : vector<16x256xi1>, vector<16x256xf32>
    %35 = arith.addf %30, %34 : vector<16x256xf32>
    %c0_i32_6 = arith.constant 0 : i32
    %36 = vector.broadcast %c0_i32_6 : i32 to vector<16x256xi32>
    %37 = arith.cmpi sgt, %14, %36 : vector<16x256xi32>
    %c1_i32_7 = arith.constant 1 : i32
    %38 = tpu.dynamic_rotate %5 by %c1_i32_7 dim 1 : vector<16x256xf32>, i32 -> vector<16x256xf32>
    %39 = arith.select %37, %38, %15 : vector<16x256xi1>, vector<16x256xf32>
    %40 = arith.addf %35, %39 : vector<16x256xf32>
    %c15_i32_8 = arith.constant 15 : i32
    %41 = vector.broadcast %c15_i32_8 : i32 to vector<16x256xi32>
    %42 = arith.cmpi slt, %14, %41 : vector<16x256xi32>
    %c255_i32 = arith.constant 255 : i32
    %43 = tpu.dynamic_rotate %5 by %c255_i32 dim 1 : vector<16x256xf32>, i32 -> vector<16x256xf32>
    %44 = arith.select %42, %43, %15 : vector<16x256xi1>, vector<16x256xf32>
    %45 = arith.addf %40, %44 : vector<16x256xf32>
    %cst_9 = arith.constant 5.000000e-01 : f32
    %46 = vector.broadcast %cst_9 : f32 to vector<16x256xf32>
    %47 = arith.cmpf ogt, %45, %46 : vector<16x256xf32>
    %cst_10 = arith.constant 1.000000e+00 : f32
    %cst_11 = arith.constant 0.000000e+00 : f32
    %48 = vector.broadcast %cst_10 : f32 to vector<16x256xf32>
    %49 = vector.broadcast %cst_11 : f32 to vector<16x256xf32>
    %50 = arith.select %47, %48, %49 : vector<16x256xi1>, vector<16x256xf32>
    %51 = tpu.iota {dimensions = array<i32: 0>} : vector<16x256xi32>
    %52 = tpu.iota {dimensions = array<i32: 1>} : vector<16x256xi32>
    %c15_i32_12 = arith.constant 15 : i32
    %53 = vector.broadcast %c15_i32_12 : i32 to vector<16x256xi32>
    %54 = arith.andi %52, %53 : vector<16x256xi32>
    %cst_13 = arith.constant 0.000000e+00 : f32
    %55 = vector.broadcast %cst_13 : f32 to vector<16x256xf32>
    %c0_i32_14 = arith.constant 0 : i32
    %56 = vector.broadcast %c0_i32_14 : i32 to vector<16x256xi32>
    %57 = arith.cmpi sgt, %51, %56 : vector<16x256xi32>
    %c1_i32_15 = arith.constant 1 : i32
    %58 = tpu.dynamic_rotate %10 by %c1_i32_15 dim 0 : vector<16x256xf32>, i32 -> vector<16x256xf32>
    %59 = arith.select %57, %58, %55 : vector<16x256xi1>, vector<16x256xf32>
    %60 = arith.addf %10, %59 : vector<16x256xf32>
    %c15_i32_16 = arith.constant 15 : i32
    %61 = vector.broadcast %c15_i32_16 : i32 to vector<16x256xi32>
    %62 = arith.cmpi slt, %51, %61 : vector<16x256xi32>
    %c15_i32_17 = arith.constant 15 : i32
    %63 = tpu.dynamic_rotate %10 by %c15_i32_17 dim 0 : vector<16x256xf32>, i32 -> vector<16x256xf32>
    %64 = arith.select %62, %63, %55 : vector<16x256xi1>, vector<16x256xf32>
    %65 = arith.addf %60, %64 : vector<16x256xf32>
    %c16_i32_18 = arith.constant 16 : i32
    %66 = vector.broadcast %c16_i32_18 : i32 to vector<16x256xi32>
    %67 = arith.cmpi sge, %52, %66 : vector<16x256xi32>
    %c16_i32_19 = arith.constant 16 : i32
    %68 = tpu.dynamic_rotate %10 by %c16_i32_19 dim 1 : vector<16x256xf32>, i32 -> vector<16x256xf32>
    %69 = arith.select %67, %68, %55 : vector<16x256xi1>, vector<16x256xf32>
    %70 = arith.addf %65, %69 : vector<16x256xf32>
    %c240_i32_20 = arith.constant 240 : i32
    %71 = vector.broadcast %c240_i32_20 : i32 to vector<16x256xi32>
    %72 = arith.cmpi slt, %52, %71 : vector<16x256xi32>
    %c240_i32_21 = arith.constant 240 : i32
    %73 = tpu.dynamic_rotate %10 by %c240_i32_21 dim 1 : vector<16x256xf32>, i32 -> vector<16x256xf32>
    %74 = arith.select %72, %73, %55 : vector<16x256xi1>, vector<16x256xf32>
    %75 = arith.addf %70, %74 : vector<16x256xf32>
    %c0_i32_22 = arith.constant 0 : i32
    %76 = vector.broadcast %c0_i32_22 : i32 to vector<16x256xi32>
    %77 = arith.cmpi sgt, %54, %76 : vector<16x256xi32>
    %c1_i32_23 = arith.constant 1 : i32
    %78 = tpu.dynamic_rotate %10 by %c1_i32_23 dim 1 : vector<16x256xf32>, i32 -> vector<16x256xf32>
    %79 = arith.select %77, %78, %55 : vector<16x256xi1>, vector<16x256xf32>
    %80 = arith.addf %75, %79 : vector<16x256xf32>
    %c15_i32_24 = arith.constant 15 : i32
    %81 = vector.broadcast %c15_i32_24 : i32 to vector<16x256xi32>
    %82 = arith.cmpi slt, %54, %81 : vector<16x256xi32>
    %c255_i32_25 = arith.constant 255 : i32
    %83 = tpu.dynamic_rotate %10 by %c255_i32_25 dim 1 : vector<16x256xf32>, i32 -> vector<16x256xf32>
    %84 = arith.select %82, %83, %55 : vector<16x256xi1>, vector<16x256xf32>
    %85 = arith.addf %80, %84 : vector<16x256xf32>
    %cst_26 = arith.constant 5.000000e-01 : f32
    %86 = vector.broadcast %cst_26 : f32 to vector<16x256xf32>
    %87 = arith.cmpf ogt, %85, %86 : vector<16x256xf32>
    %cst_27 = arith.constant 1.000000e+00 : f32
    %cst_28 = arith.constant 0.000000e+00 : f32
    %88 = vector.broadcast %cst_27 : f32 to vector<16x256xf32>
    %89 = vector.broadcast %cst_28 : f32 to vector<16x256xf32>
    %90 = arith.select %87, %88, %89 : vector<16x256xi1>, vector<16x256xf32>
    %91 = arith.mulf %50, %90 : vector<16x256xf32>
    %cst_29 = arith.constant dense<0.000000e+00> : vector<16xf32>
    %92 = vector.multi_reduction <add>, %91, %cst_29 [1] : vector<16x256xf32> to vector<16xf32>
    %93 = vector.shape_cast %92 : vector<16xf32> to vector<16x1xf32>
    %cst_30 = arith.constant dense<0.000000e+00> : vector<1xf32>
    %94 = vector.multi_reduction <add>, %93, %cst_30 [0] : vector<16x1xf32> to vector<1xf32>
    %95 = vector.shape_cast %94 : vector<1xf32> to vector<1x1xf32>
    %c0_31 = arith.constant 0 : index
    %c0_32 = arith.constant 0 : index
    %96 = vector.load %arg3[%c0_31, %c0_32] : memref<1x1xf32, #tpu.memory_space<vmem>>, vector<1x1xf32>
    tpu.vector_store %arg3[%c0_31, %c0_32], %95 {strides = array<i32>} : memref<1x1xf32, #tpu.memory_space<vmem>>, vector<1x1xf32>,
    return
  }
  func.func @transform_0(%arg0: i32) -> (i32, i32) {
    %c0_i32 = arith.constant 0 : i32
    %c0_i32_0 = arith.constant 0 : i32
    %c0_i32_1 = arith.constant 0 : i32
    return %c0_i32, %c0_i32_0 : i32, i32
  }
  func.func @transform_1(%arg0: i32) -> i32 {
    %c0_i32 = arith.constant 0 : i32
    %c0_i32_0 = arith.constant 0 : i32
    return %c0_i32 : i32
  }
  func.func @transform_2(%arg0: i32) -> (i32, i32) {
    %c0_i32 = arith.constant 0 : i32
    %c0_i32_0 = arith.constant 0 : i32
    %c0_i32_1 = arith.constant 0 : i32
    return %c0_i32, %c0_i32_0 : i32, i32
  }
}

</mosaic_0001>

<bundles_post_ra>
// kernel: run.1
= control target key start
LH: loop header
LB: loop body
LE: loop exit
PB: predicated region body
PF: predicated region fallthrough
CT: control target
= control target key end

     0   :  { %7 = vsyncpa [#allocation3], 0  ;;  %s836_s0 = inlined_call_operand.hbm [shape: f32[16,256], index: 0, kind: input, shape index: {}]   ;;  %s837_s1 = inlined_call_operand.vmem [shape: f32[2], index: 1, kind: input, shape index: {}]   ;;  %s838_s2 = inlined_call_operand.hbm [shape: f32[1,1], index: 2, kind: output, shape index: {}]  }
   0x1   :  { %8 = vsyncpa [#allocation5], 0 }
   0x2   :  { %9 = vsyncpa [#allocation4], 0  ;;  %s528_s9 = smov [#allocation2]   ;;  %s28_s13 = sshll.u32 %s837_s1, 4  ;;  %s29_s13 = int_to_ptr.vmem [resolvable:$true] %s28_s13 }
   0x3   :  { %s15_s10 = sshll.u32 %s528_s9, 4  ;;  %s16_s10 = int_to_ptr.vmem [resolvable:$true] %s15_s10 }
   0x4   :  { %s478_s14 = scalar_lea.vmem %s16_s10, 512  ;;  %p483_p1 = scmp.lt.s32.totalorder %s16_s10, %s16_s10 }
   0x5   :  { %p479_p0 = scmp.ne.s32.totalorder %s16_s10, %s478_s14  ;;  %p484_p2 = scmp.lt.s32.totalorder %s478_s14, %s478_s14 }
   0x7   :  { %p485_p3 = por %p484_p2, %p483_p1 }
   0x9   :  { %p486_p4 = pnand %p485_p3, %p479_p0 }
   0xb   :  { %489 = shalt.err (!%p486_p4)
}
   0xc   :  { %s529_s15 = smov 256   ;;  %s530_s16 = smov 16  }
   0xd   :  { %21 = dma.hbm_to_vmem [thread:$0]  %s836_s0, 512, %s16_s10, [#allocation3], %s529_s15, %s529_s15, %s530_s16  }
   0xe   :  { %s490_s19 = scalar_lea.vmem %s29_s13, 16  ;;  %p495_p6 = scmp.lt.s32.totalorder %s29_s13, %s29_s13 }
   0xf   :  { %p491_p5 = scmp.ne.s32.totalorder %s29_s13, %s490_s19  ;;  %p496_p7 = scmp.lt.s32.totalorder %s490_s19, %s490_s19 }
  0x11   :  { %p497_p8 = por %p496_p7, %p495_p6 }
  0x13   :  { %p498_p9 = pnand %p497_p8, %p491_p5 }
  0x15   :  { %501 = shalt.err (!%p498_p9)
}
  0x16   :  { %s531_s1 = smov [#allocation6]  }
  0x17   :  { %31 = dma.vmem_to_smem %s29_s13, 16, %s531_s1, [#allocation5]  }
  0x18   :  { %522 = dma.done.wait [#allocation3], 512  }
  0x19   :  { %523 = vsyncadd [#allocation3], 4294966784 }
  0x1a   :  { %524 = dma.done.wait [#allocation5], 16  }
  0x1b   :  { %525 = vsyncadd [#allocation5], 4294967280 }
  0x1c   :  { %38 = sfence }
  0x1d   :  { %s376_s20 = sld [smem:[#allocation6 + $0x1]]  ;;  %v71_v0 = vlaneseq  ;;  %v39_v2 = vld [vmem:[#allocation2] sm:$0xff]  ;;  %v41_v3 = vld [vmem:[#allocation2 + $0x10] sm:$0xff]  ;;  %v40_v4 = vld [vmem:[#allocation2 + $0x8] sm:$0xff]  ;;  %v532_v9 = vmov 0.0   ;;  %s533_s0 = smov 112  }
  0x1e   :  { %s43_s21 = sld [smem:[#allocation6]]  ;;  %v42_v6 = vld [vmem:[#allocation2 + $0x18] sm:$0xff]  ;;  %s534_s22 = smov 1  }
  0x1f   :  { %v560_v1 = vshrl.u32 %v71_v0, 7  ;;  %s535_s23 = smov 127   ;;  %s536_s24 = smov [#allocation7]  }
  0x20   :  { %s362_s25 = sshll.u32 %s536_s24, 4  ;;  %s363_s25 = int_to_ptr.vmem [resolvable:$true] %s362_s25 }
  0x21   :  { %v563_v7 = vadd.s32 8, %v560_v1  ;;  %vm79_vm8 = vcmp.gt.s32.totalorder %v560_v1, 0  ;;  %vm85_vm9 = vcmp.lt.s32.totalorder %v560_v1, 1  ;;  %vm104_vm11 = vcmp.lt.s32.totalorder %v560_v1, 7  ;;  %s502_s26 = scalar_lea.vmem %s363_s25, 16  ;;  %s506_s27 = scalar_lea.vmem %s363_s25, 32 }
  0x22   :  { %p503_p10 = scmp.ne.s32.totalorder %s363_s25, %s502_s26  ;;  %p507_p11 = scmp.lt.s32.totalorder %s363_s25, %s363_s25 }
  0x23   :  { %v58_v5 = vstv %s376_s20  ;;  %vm99_vm10 = vcmp.lt.s32.totalorder %v563_v7, 15  ;;  %p508_p12 = scmp.lt.s32.totalorder %s506_s27, %s502_s26 }
  0x24   :  { %vm59_vm0 = vcmp.eq.f32.partialorder %v39_v2, %v58_v5  ;;  %vm61_vm1 = vcmp.eq.f32.partialorder %v41_v3, %v58_v5  ;;  %v44_v8 = vstv %s43_s21  ;;  %vm60_vm2 = vcmp.eq.f32.partialorder %v40_v4, %v58_v5 }
  0x25   :  { %v377_v10 = vsel %vm59_vm0, 1.0, %v532_v9  ;;  %v379_v11 = vsel %vm61_vm1, 1.0, %v532_v9  ;;  %vm45_vm3 = vcmp.eq.f32.partialorder %v39_v2, %v44_v8  ;;  %vm47_vm4 = vcmp.eq.f32.partialorder %v41_v3, %v44_v8  ;;  %p509_p13 = por %p508_p12, %p507_p11 }
  0x26   :  { %v567_v12 = vpack.i.bf16 %v379_v11, %v377_v10  ;;  %v570_v13 = vsel %vm45_vm3, 1.0, %v532_v9  ;;  %v573_v14 = vsel %vm47_vm4, 1.0, %v532_v9  ;;  %vm62_vm5 = vcmp.eq.f32.partialorder %v42_v6, %v58_v5 }
  0x27   :  { %v577_v15 = vpack.i.bf16 %v573_v14, %v570_v13  ;;  %v378_v16 = vsel %vm60_vm2, 1.0, %v532_v9  ;;  %v380_v17 = vsel %vm62_vm5, 1.0, %v532_v9  ;;  %vm46_vm6 = vcmp.eq.f32.partialorder %v40_v4, %v44_v8  ;;  %p510_p0 = pnand %p509_p13, %p503_p10 }
  0x28   :  { %401 = vrot.lane.b32.xlu1 %v567_v12, %s530_s16  ;;  %v583_v18 = vpack.i.bf16 %v380_v17, %v378_v16  ;;  %vm48_vm7 = vcmp.eq.f32.partialorder %v42_v6, %v44_v8  ;;  %v373_v19 = vsel %vm46_vm6, 1.0, %v532_v9  ;;  %v218_v22 = vrot.slane %v378_v16, 7 }
  0x29   :  { %391 = vrot.lane.b32.xlu0 %v577_v15, %s530_s16  ;;  %v375_v20 = vsel %vm48_vm7, 1.0, %v532_v9  ;;  %v219_v23 = vrot.slane %v379_v11, 7  ;;  %v220_v24 = vrot.slane %v380_v17, 7  ;;  %v234_v25 = vrot.slane %v378_v16, 1 }
  0x2a   :  { %v591_v21 = vpack.i.bf16 %v375_v20, %v373_v19  ;;  %v235_v26 = vrot.slane %v379_v11, 1  ;;  %v236_v27 = vrot.slane %v380_v17, 1  ;;  %v217_v28 = vrot.slane %v377_v10, 7 }
  0x2b   :  { %v222_v29 = vsel %vm85_vm9, %v218_v22, %v220_v24  ;;  %v224_v30 = vsel %vm85_vm9, %v220_v24, %v218_v22  ;;  %v233_v31 = vrot.slane %v377_v10, 1  ;;  %v82_v32 = vrot.slane %v373_v19, 7 }
  0x2c   :  { %406 = vrot.lane.b32.xlu1 %v583_v18, %s530_s16  ;;  %v226_v33 = vsel %vm79_vm8, %v224_v30, 0.0  ;;  %v232_v34 = vadd.f32 %v380_v17, %v222_v29  ;;  %v238_v35 = vsel %vm104_vm11, %v234_v25, %v236_v27  ;;  %v240_v36 = vsel %vm104_vm11, %v236_v27, %v234_v25 }
  0x2d   :  { %396 = vrot.lane.b32.xlu0 %v591_v21, %s530_s16  ;;  %v230_v37 = vadd.f32 %v378_v16, %v226_v33  ;;  %v244_v38 = vsel %vm99_vm10, %v240_v36, 0.0  ;;  %v221_v39 = vsel %vm85_vm9, %v217_v28, %v219_v23  ;;  %v223_v40 = vsel %vm85_vm9, %v219_v23, %v217_v28 }
  0x2e   :  { %v617_v41 = vadd.f32 %v244_v38, %v232_v34  ;;  %v225_v42 = vsel %vm79_vm8, %v223_v40, 0.0  ;;  %v231_v43 = vadd.f32 %v379_v11, %v221_v39  ;;  %v237_v44 = vsel %vm104_vm11, %v233_v31, %v235_v26 }
  0x2f   :  { %v623_v45 = vadd.f32 %v238_v35, %v230_v37  ;;  %v229_v46 = vadd.f32 %v377_v10, %v225_v42  ;;  %v239_v47 = vsel %vm104_vm11, %v235_v26, %v233_v31  ;;  %v83_v48 = vrot.slane %v573_v14, 7 }
  0x30   :  { %416 = vrot.lane.b32.xlu1 %v591_v21, %s533_s0  ;;  %v243_v49 = vsel %vm99_vm10, %v239_v47, 0.0  ;;  %v84_v50 = vrot.slane %v375_v20, 7  ;;  %v101_v51 = vrot.slane %v373_v19, 1  ;;  %v102_v52 = vrot.slane %v573_v14, 1 }
  0x31   :  { %411 = vrot.lane.b32.xlu0 %v577_v15, %s533_s0  ;;  %v632_v53 = vadd.f32 %v237_v44, %v229_v46  ;;  %v634_v54 = vadd.f32 %v243_v49, %v231_v43  ;;  %v103_v55 = vrot.slane %v375_v20, 1  ;;  %v81_v56 = vrot.slane %v570_v13, 7 }
  0x32   :  { %v87_v57 = vsel %vm85_vm9, %v82_v32, %v84_v50  ;;  %v89_v58 = vsel %vm85_vm9, %v84_v50, %v82_v32  ;;  %v100_v59 = vrot.slane %v570_v13, 1 }
  0x33   :  { %v91_v60 = vsel %vm79_vm8, %v89_v58, 0.0  ;;  %v97_v61 = vadd.f32 %v375_v20, %v87_v57  ;;  %v106_v62 = vsel %vm104_vm11, %v101_v51, %v103_v55  ;;  %v108_v63 = vsel %vm104_vm11, %v103_v55, %v101_v51 }
  0x34   :  { %426 = vrot.lane.b32.xlu1 %v583_v18, %s533_s0  ;;  %v95_v2 = vadd.f32 %v373_v19, %v91_v60  ;;  %v112_v3 = vsel %vm99_vm10, %v108_v63, 0.0  ;;  %v86_v4 = vsel %vm85_vm9, %v81_v56, %v83_v48  ;;  %v88_v5 = vsel %vm85_vm9, %v83_v48, %v81_v56 }
  0x35   :  { %421 = vrot.lane.b32.xlu0 %v567_v12, %s533_s0  ;;  %v656_v6 = vadd.f32 %v112_v3, %v97_v61  ;;  %v90_v8 = vsel %vm79_vm8, %v88_v5, 0.0  ;;  %v96_v10 = vadd.f32 %v573_v14, %v86_v4  ;;  %v105_v11 = vsel %vm104_vm11, %v100_v59, %v102_v52 }
  0x36   :  { %v664_v16 = vadd.f32 %v106_v62, %v95_v2  ;;  %v94_v17 = vadd.f32 %v570_v13, %v90_v8  ;;  %v107_v19 = vsel %vm104_vm11, %v102_v52, %v100_v59  ;;  %v678_v13 = vand.u32 127, %v71_v0 }
  0x37   :  { %v111_v20 = vsel %vm99_vm10, %v107_v19, 0.0 }
  0x38   :  { %436 = vrot.lane.b32.xlu1 %v591_v21, %s534_s22  ;;  %v113_v22 = vadd.f32 %v105_v11, %v94_v17  ;;  %v115_v23 = vadd.f32 %v111_v20, %v96_v10  ;;  %vm127_vm12 = vcmp.lt.s32.totalorder %v678_v13, 16  ;;  %v682_v24 = vadd.s32 128, %v678_v13 }
  0x39   :  { %431 = vrot.lane.b32.xlu0 %v577_v15, %s534_s22  ;;  %vm117_vm13 = vcmp.ge.s32.totalorder %v678_v13, 16  ;;  %v77_v34 = vand.u32 15, %v678_v13  ;;  %vm150_vm15 = vcmp.lt.s32.totalorder %v678_v13, 112  ;;  %vm173_vm0 = vcmp.lt.s32.totalorder %v678_v13, 1 }
  0x3a   :  { %v78_v35 = vand.u32 15, %v682_v24  ;;  %vm141_vm14 = vcmp.lt.s32.totalorder %v682_v24, 240  ;;  %vm196_vm3 = vcmp.lt.s32.totalorder %v678_v13, 127 }
  0x3b   :  { %vm716_vm1 = vcmp.gt.s32.totalorder %v77_v34, 0  ;;  %vm753_vm4 = vcmp.lt.s32.totalorder %v77_v34, 15 }
  0x3c   :  { %446 = vrot.lane.b32.xlu1 %v583_v18, %s534_s22  ;;  %vm720_vm2 = vcmp.gt.s32.totalorder %v78_v35, 0  ;;  %vm757_vm5 = vcmp.lt.s32.totalorder %v78_v35, 15 }
  0x3d   :  { %441 = vrot.lane.b32.xlu0 %v567_v12, %s534_s22 }
  0x40   :  { %456 = vrot.lane.b32.xlu1 %v591_v21, %s535_s23 }
  0x41   :  { %451 = vrot.lane.b32.xlu0 %v577_v15, %s535_s23 }
  0x44   :  { %466 = vrot.lane.b32.xlu1 %v583_v18, %s535_s23 }
  0x45   :  { %461 = vrot.lane.b32.xlu0 %v567_v12, %s535_s23 }
  0x9a   :  { %v402_v1 = vpop.permute.xlu1 %401 }
  0x9b   :  { %v392_v7 = vpop.permute.xlu0 %391  ;;  %v404_v25 = vunpack.i.h.bf16 %v402_v1  ;;  %v403_v26 = vunpack.i.l.bf16 %v402_v1 }
  0x9c   :  { %v394_v31 = vunpack.i.h.bf16 %v392_v7  ;;  %v393_v32 = vunpack.i.l.bf16 %v392_v7 }
  0x9e   :  { %v407_v14 = vpop.permute.xlu1 %406 }
  0x9f   :  { %v409_v21 = vunpack.i.h.bf16 %v407_v14  ;;  %v408_v27 = vunpack.i.l.bf16 %v407_v14  ;;  %v397_v15 = vpop.permute.xlu0 %396 }
  0xa0   :  { %v399_v18 = vunpack.i.h.bf16 %v397_v15  ;;  %v398_v12 = vunpack.i.l.bf16 %v397_v15 }
  0xa1   :  { %v257_v0 = vsel %vm127_vm12, %v403_v26, %v408_v27  ;;  %v258_v28 = vsel %vm127_vm12, %v404_v25, %v409_v21  ;;  %v259_v29 = vsel %vm127_vm12, %v408_v27, %v403_v26  ;;  %v260_v30 = vsel %vm127_vm12, %v409_v21, %v404_v25 }
  0xa2   :  { %v417_v33 = vpop.permute.xlu1 %416  ;;  %v261_v36 = vsel %vm117_vm13, %v259_v29, 0.0  ;;  %v263_v37 = vsel %vm117_vm13, %v260_v30, 0.0  ;;  %v266_v39 = vadd.f32 %v257_v0, %v623_v45  ;;  %v268_v40 = vadd.f32 %v258_v28, %v617_v41 }
  0xa3   :  { %v412_v38 = vpop.permute.xlu0 %411  ;;  %v130_v42 = vsel %vm127_vm12, %v398_v12, %v393_v32  ;;  %v131_v43 = vsel %vm127_vm12, %v399_v18, %v394_v31  ;;  %v419_v47 = vunpack.i.h.bf16 %v417_v33  ;;  %v418_v48 = vunpack.i.l.bf16 %v417_v33 }
  0xa4   :  { %v132_v44 = vsel %vm117_vm13, %v130_v42, 0.0  ;;  %v134_v46 = vsel %vm117_vm13, %v131_v43, 0.0  ;;  %v128_v45 = vsel %vm127_vm12, %v393_v32, %v398_v12  ;;  %v129_v41 = vsel %vm127_vm12, %v394_v31, %v399_v18 }
  0xa5   :  { %v414_v49 = vunpack.i.h.bf16 %v412_v38  ;;  %v413_v50 = vunpack.i.l.bf16 %v412_v38  ;;  %v136_v56 = vadd.f32 %v132_v44, %v113_v22  ;;  %v138_v57 = vadd.f32 %v134_v46, %v115_v23 }
  0xa6   :  { %v427_v51 = vpop.permute.xlu1 %426  ;;  %v265_v3 = vadd.f32 %v261_v36, %v632_v53  ;;  %v267_v4 = vadd.f32 %v263_v37, %v634_v54  ;;  %v137_v5 = vadd.f32 %v128_v45, %v664_v16  ;;  %v139_v8 = vadd.f32 %v129_v41, %v656_v6 }
  0xa7   :  { %v429_v58 = vunpack.i.h.bf16 %v427_v51  ;;  %v428_v59 = vunpack.i.l.bf16 %v427_v51  ;;  %v422_v60 = vpop.permute.xlu0 %421  ;;  %v152_v61 = vsel %vm150_vm15, %v414_v49, %v419_v47  ;;  %v154_v62 = vsel %vm150_vm15, %v419_v47, %v414_v49 }
  0xa8   :  { %v151_v63 = vsel %vm150_vm15, %v413_v50, %v418_v48  ;;  %v153_v2 = vsel %vm150_vm15, %v418_v48, %v413_v50  ;;  %v158_v10 = vsel %vm141_vm14, %v154_v62, 0.0  ;;  %v424_v17 = vunpack.i.h.bf16 %v422_v60 }
  0xa9   :  { %v156_v11 = vsel %vm141_vm14, %v153_v2, 0.0  ;;  %v423_v19 = vunpack.i.l.bf16 %v422_v60  ;;  %v159_v22 = vadd.f32 %v151_v63, %v136_v56  ;;  %v161_v23 = vadd.f32 %v152_v61, %v138_v57 }
  0xaa   :  { %v437_v20 = vpop.permute.xlu1 %436  ;;  %v278_v54 = vsel %vm150_vm15, %v424_v17, %v429_v58  ;;  %v280_v6 = vsel %vm150_vm15, %v429_v58, %v424_v17  ;;  %v160_v25 = vadd.f32 %v156_v11, %v137_v5  ;;  %v162_v26 = vadd.f32 %v158_v10, %v139_v8 }
  0xab   :  { %v439_v1 = vunpack.i.h.bf16 %v437_v20  ;;  %v438_v7 = vunpack.i.l.bf16 %v437_v20  ;;  %v432_v53 = vpop.permute.xlu0 %431  ;;  %v277_v16 = vsel %vm150_vm15, %v423_v19, %v428_v59  ;;  %v279_v14 = vsel %vm150_vm15, %v428_v59, %v423_v19 }
  0xac   :  { %v284_v21 = vsel %vm141_vm14, %v280_v6, 0.0  ;;  %v282_v27 = vsel %vm141_vm14, %v279_v14, 0.0  ;;  %v287_v15 = vadd.f32 %v278_v54, %v267_v4  ;;  %v285_v18 = vadd.f32 %v277_v16, %v265_v3 }
  0xad   :  { %v434_v12 = vunpack.i.h.bf16 %v432_v53  ;;  %v433_v0 = vunpack.i.l.bf16 %v432_v53  ;;  %v288_v31 = vadd.f32 %v284_v21, %v268_v40  ;;  %v286_v32 = vadd.f32 %v282_v27, %v266_v39 }
  0xae   :  { %v447_v28 = vpop.permute.xlu1 %446  ;;  %vm354_vm14 = vcmask 0  }
  0xaf   :  { %v449_v33 = vunpack.i.h.bf16 %v447_v28  ;;  %v448_v24 = vunpack.i.l.bf16 %v447_v28  ;;  %v442_v36 = vpop.permute.xlu0 %441  ;;  %v175_v37 = vsel %vm173_vm0, %v434_v12, %v439_v1  ;;  %v177_v38 = vsel %vm173_vm0, %v439_v1, %v434_v12 }
  0xb0   :  { %v174_v34 = vsel %vm173_vm0, %v433_v0, %v438_v7  ;;  %v176_v35 = vsel %vm173_vm0, %v438_v7, %v433_v0  ;;  %v180_v42 = vsel %vm716_vm1, %v177_v38, 0.0  ;;  %v181_v39 = vsel %vm720_vm2, %v175_v37, 0.0 }
  0xb1   :  { %v178_v40 = vsel %vm716_vm1, %v176_v35, 0.0  ;;  %v179_v43 = vsel %vm720_vm2, %v174_v34, 0.0  ;;  %v444_v44 = vunpack.i.h.bf16 %v442_v36  ;;  %v443_v46 = vunpack.i.l.bf16 %v442_v36 }
  0xb2   :  { %v457_v47 = vpop.permute.xlu1 %456  ;;  %v182_v48 = vadd.f32 %v178_v40, %v159_v22  ;;  %v183_v45 = vadd.f32 %v179_v43, %v160_v25  ;;  %v184_v51 = vadd.f32 %v180_v42, %v161_v23  ;;  %v185_v56 = vadd.f32 %v181_v39, %v162_v26 }
  0xb3   :  { %v459_v41 = vunpack.i.h.bf16 %v457_v47  ;;  %v458_v49 = vunpack.i.l.bf16 %v457_v47  ;;  %v452_v50 = vpop.permute.xlu0 %451  ;;  %v298_v57 = vsel %vm173_vm0, %v444_v44, %v449_v33  ;;  %v300_v58 = vsel %vm173_vm0, %v449_v33, %v444_v44 }
  0xb4   :  { %v297_v59 = vsel %vm173_vm0, %v443_v46, %v448_v24  ;;  %v299_v60 = vsel %vm173_vm0, %v448_v24, %v443_v46  ;;  %v303_v61 = vsel %vm716_vm1, %v300_v58, 0.0  ;;  %v304_v62 = vsel %vm720_vm2, %v298_v57, 0.0 }
  0xb5   :  { %v301_v63 = vsel %vm716_vm1, %v299_v60, 0.0  ;;  %v302_v2 = vsel %vm720_vm2, %v297_v59, 0.0  ;;  %v454_v3 = vunpack.i.h.bf16 %v452_v50  ;;  %v453_v4 = vunpack.i.l.bf16 %v452_v50 }
  0xb6   :  { %v467_v5 = vpop.permute.xlu1 %466  ;;  %v305_v8 = vadd.f32 %v301_v63, %v285_v18  ;;  %v306_v10 = vadd.f32 %v302_v2, %v286_v32  ;;  %v307_v20 = vadd.f32 %v303_v61, %v287_v15  ;;  %v308_v22 = vadd.f32 %v304_v62, %v288_v31 }
  0xb7   :  { %v469_v11 = vunpack.i.h.bf16 %v467_v5  ;;  %v468_v17 = vunpack.i.l.bf16 %v467_v5  ;;  %v462_v19 = vpop.permute.xlu0 %461  ;;  %v198_v23 = vsel %vm196_vm3, %v454_v3, %v459_v41  ;;  %v200_v52 = vsel %vm196_vm3, %v459_v41, %v454_v3 }
  0xb8   :  { %v197_v55 = vsel %vm196_vm3, %v453_v4, %v458_v49  ;;  %v199_v1 = vsel %vm196_vm3, %v458_v49, %v453_v4  ;;  %v464_v7 = vunpack.i.h.bf16 %v462_v19  ;;  %v463_v53 = vunpack.i.l.bf16 %v462_v19 }
  0xb9   :  { %v201_v54 = vsel %vm753_vm4, %v197_v55, 0.0  ;;  %v202_v6 = vsel %vm757_vm5, %v199_v1, 0.0  ;;  %v203_v25 = vsel %vm753_vm4, %v198_v23, 0.0  ;;  %v204_v26 = vsel %vm757_vm5, %v200_v52, 0.0 }
  0xba   :  { %v205_v16 = vadd.f32 %v201_v54, %v182_v48  ;;  %v206_v14 = vadd.f32 %v202_v6, %v183_v45  ;;  %v318_v21 = vsel %vm196_vm3, %v464_v7, %v469_v11  ;;  %v320_v27 = vsel %vm196_vm3, %v469_v11, %v464_v7 }
  0xbb   :  { %v317_v15 = vsel %vm196_vm3, %v463_v53, %v468_v17  ;;  %v319_v18 = vsel %vm196_vm3, %v468_v17, %v463_v53  ;;  %v207_v24 = vadd.f32 %v203_v25, %v184_v51  ;;  %v208_v36 = vadd.f32 %v204_v26, %v185_v56 }
  0xbc   :  { %vm209_vm6 = vcmp.gt.f32.partialorder %v205_v16, 0.5  ;;  %vm210_vm7 = vcmp.gt.f32.partialorder %v206_v14, 0.5  ;;  %v321_v12 = vsel %vm753_vm4, %v317_v15, 0.0  ;;  %v322_v0 = vsel %vm757_vm5, %v319_v18, 0.0 }
  0xbd   :  { %v213_v28 = vsel %vm209_vm6, 1.0, %v532_v9  ;;  %v214_v31 = vsel %vm210_vm7, 1.0, %v532_v9  ;;  %v325_v32 = vadd.f32 %v321_v12, %v305_v8  ;;  %v326_v33 = vadd.f32 %v322_v0, %v306_v10 }
  0xbe   :  { %v323_v13 = vsel %vm753_vm4, %v318_v21, 0.0  ;;  %v324_v37 = vsel %vm757_vm5, %v320_v27, 0.0  ;;  %vm211_vm10 = vcmp.gt.f32.partialorder %v207_v24, 0.5  ;;  %vm212_vm11 = vcmp.gt.f32.partialorder %v208_v36, 0.5 }
  0xbf   :  { %vm329_vm8 = vcmp.gt.f32.partialorder %v325_v32, 0.5  ;;  %vm330_vm9 = vcmp.gt.f32.partialorder %v326_v33, 0.5  ;;  %v327_v38 = vadd.f32 %v323_v13, %v307_v20  ;;  %v328_v34 = vadd.f32 %v324_v37, %v308_v22 }
  0xc0   :  { %v333_v35 = vsel %vm329_vm8, 1.0, %v532_v9  ;;  %v334_v42 = vsel %vm330_vm9, 1.0, %v532_v9  ;;  %v215_v43 = vsel %vm211_vm10, 1.0, %v532_v9  ;;  %v216_v30 = vsel %vm212_vm11, 1.0, %v532_v9 }
  0xc1   :  { %v337_v39 = vmul.f32 %v333_v35, %v213_v28  ;;  %v338_v40 = vmul.f32 %v334_v42, %v214_v31  ;;  %vm331_vm12 = vcmp.gt.f32.partialorder %v327_v38, 0.5  ;;  %vm332_vm13 = vcmp.gt.f32.partialorder %v328_v34, 0.5 }
  0xc2   :  { %v335_v44 = vsel %vm331_vm12, 1.0, %v532_v9  ;;  %v336_v46 = vsel %vm332_vm13, 1.0, %v532_v9 }
  0xc3   :  { %v341_v29 = vadd.f32 %v338_v40, %v337_v39  ;;  %v339_v47 = vmul.f32 %v335_v44, %v215_v43  ;;  %v340_v48 = vmul.f32 %v336_v46, %v216_v30 }
  0xc5   :  { %342 = vadd.xlane.f32.xlu0 %v341_v29  ;;  %v344_v45 = vadd.f32 %v340_v48, %v339_v47 }
  0xc7   :  { %345 = vadd.xlane.f32.xlu1 %v344_v45 }
 0x14e   :  { %v343_v41 = vpop.xlane.xlu0 %342 }
 0x150   :  { %v346_v49 = vpop.xlane.xlu1 %345 }
 0x151   :  { %v347_v50 = vadd.f32 %v346_v49, %v343_v41 }
 0x153   :  { %v348_v51 = vrot.slane %v347_v50, 4 }
 0x155   :  { %v349_v56 = vadd.f32 %v348_v51, %v347_v50 }
 0x157   :  { %v350_v57 = vrot.slane %v349_v56, 2 }
 0x159   :  { %v351_v58 = vadd.f32 %v350_v57, %v349_v56 }
 0x15b   :  { %v352_v59 = vrot.slane %v351_v58, 1 }
 0x15d   :  { %v353_v60 = vadd.f32 %v352_v59, %v351_v58 }
 0x15f   :  { %355 = vst.msk [vmem:[#allocation7] sm:$0x1] %vm354_vm14, %v353_v60 }
 0x160   :  { %513 = shalt.err (!%p510_p0)
}
 0x161   :  { %365 = dma.vmem_to_hbm [thread:$0]  %s363_s25, 16, %s838_s2, [#allocation4]  }
 0x162   :  { %526 = dma.done.wait [#allocation4], 16  }
 0x163   :  { %527 = vsyncadd [#allocation4], 4294967280 }
 0x164   :  { %369 = vsyncpa [#allocation3], 1 }
 0x165   :  { %370 = vsyncpa [#allocation4], 1 }
 0x166   :  { %371 = vsyncpa [#allocation5], 1 }

</bundles_post_ra>
